<compile_context>
chip_gen: v7x
topology: tpu7x:2x2x1
jax: 0.10.0
libtpu: 0.0.40
codegen_flags: <defaults>
</compile_context>

<pallas_src>
import functools
import math

import jax
import jax.numpy as jnp
from jax.experimental import pallas as pl
from jax.experimental.pallas import tpu as pltpu

EPS = 1e-8
_SUBLANES = 8      # f32 sublanes per vreg (compute is always f32 in-kernel)
_LANES = 128


def _cdiv(a, b):
    return -(-a // b)


# ------------------------------ kernel body ----------------------------------
def _si_snr_moments_kernel(src_ref, est_ref, out_ref, acc_ref, *, rem):
    """Streaming 5-moment accumulation over tiles of the (folded) time axis.

    grid = (num_cores, tiles_per_core); axis 0 is "parallel" (2-way split of
    the time reduction for v7x megacore; a plain loop reorder on 1-TC chips),
    axis 1 is the "arbitrary" reduction axis.

    acc_ref : VMEM (5, B_fold, 1) f32 rows = [sum_s, sum_e, sum_ss, sum_ee,
              sum_se].  out_ref block (1, 5, B_fold, 1) holds this core's
              partial moments, written once on the core's last step.
    rem     : static; number of valid lanes in the last *global* tile
              (0 => every tile is full and no mask code is emitted at all).
    """
    p = pl.program_id(0)
    k = pl.program_id(1)
    n_p = pl.num_programs(0)
    n_k = pl.num_programs(1)

    @pl.when(k == 0)
    def _init():
        acc_ref[...] = jnp.zeros_like(acc_ref)

    s = src_ref[...].astype(jnp.float32)      # (B_fold, tile_t)
    e = est_ref[...].astype(jnp.float32)      # (B_fold, tile_t)

    def _accumulate(s_v, e_v):
        acc_ref[0] += jnp.sum(s_v, axis=-1, keepdims=True)
        acc_ref[1] += jnp.sum(e_v, axis=-1, keepdims=True)
        acc_ref[2] += jnp.sum(s_v * s_v, axis=-1, keepdims=True)
        acc_ref[3] += jnp.sum(e_v * e_v, axis=-1, keepdims=True)
        acc_ref[4] += jnp.sum(s_v * e_v, axis=-1, keepdims=True)

    if rem:
        # Only the very last global tile is ragged; keep the steady state
        # mask-free (masking every tile pushed the kernel to VALU-bound).
        is_tail = jnp.logical_and(p == n_p - 1, k == n_k - 1)

        @pl.when(jnp.logical_not(is_tail))
        def _steady():
            _accumulate(s, e)

        @pl.when(is_tail)
        def _tail():
            lane = jax.lax.broadcasted_iota(jnp.int32, s.shape, 1)
            valid = lane < rem
            _accumulate(jnp.where(valid, s, 0.0), jnp.where(valid, e, 0.0))
    else:
        _accumulate(s, e)

    @pl.when(k == n_k - 1)
    def _store():
        out_ref[0] = acc_ref[...]


# -------------------------------- wrapper ------------------------------------
def si_snr_loss(source, estimate_source, *, tile_t=None):
    """-mean(SI-SNR) with PyTorch truncation-to-shorter semantics."""
    t = int(min(source.shape[-1], estimate_source.shape[-1]))

    # Flatten leading dims to one batch axis (mean over sisnr == mean over rows).
    b = 1
    for d in source.shape[:-1]:
        b *= int(d)
    b = max(b, 1)
    src = source.reshape(b, source.shape[-1])
    est = estimate_source.reshape(b, estimate_source.shape[-1])

    # ---- sublane fold: (b, t) -> (b*c, t/c) so rows fill all 8 f32 sublanes.
    c = 1
    if b % _SUBLANES != 0:
        cand = _SUBLANES // math.gcd(b, _SUBLANES)   # b*cand = lcm(b, 8)
        if t % cand == 0:
            c = cand
        # else: fall back to unfolded rows (correct, just fewer sublanes used)
    if c > 1:
        if src.shape[-1] != t:
            src = src[:, :t]          # wrapper slice only when truncating
        if est.shape[-1] != t:
            est = est[:, :t]
        src = src.reshape(b * c, t // c)
        est = est.reshape(b * c, t // c)
    b_fold = b * c
    t_fold = t // c

    # ---- tile sizing: ~3 MiB f32 compute tile per step (no 16K cap).
    auto_tile = tile_t is None
    if auto_tile:
        f32_tile_budget = 3 * 1024 * 1024
        tile_t = f32_tile_budget // (b_fold * 4)
    tile_t = max(_LANES, (int(tile_t) // _LANES) * _LANES)
    tile_t = min(tile_t, _cdiv(t_fold, _LANES) * _LANES)

    nk_total = _cdiv(t_fold, tile_t)
    if auto_tile and nk_total > 1 and nk_total % 2 != 0:
        # Nudge the tile size down so the tile count is even, enabling the
        # 2-way "parallel" split (both v7x TensorCores) without duplicate DMAs.
        alt = max(_LANES, _cdiv(_cdiv(t_fold, nk_total + 1), _LANES) * _LANES)
        if _cdiv(t_fold, alt) % 2 == 0:
            tile_t = alt
            nk_total = _cdiv(t_fold, alt)

    num_cores = 2 if (nk_total >= 2 and nk_total % 2 == 0) else 1
    kpc = nk_total // num_cores               # tiles per core
    rem = t_fold % tile_t                     # valid lanes in last global tile

    kernel = functools.partial(_si_snr_moments_kernel, rem=rem)
    moments = pl.pallas_call(
        kernel,
        out_shape=jax.ShapeDtypeStruct((num_cores, 5, b_fold, 1), jnp.float32),
        grid=(num_cores, kpc),
        in_specs=[
            pl.BlockSpec((b_fold, tile_t), lambda p, k: (0, p * kpc + k)),
            pl.BlockSpec((b_fold, tile_t), lambda p, k: (0, p * kpc + k)),
        ],
        out_specs=pl.BlockSpec((1, 5, b_fold, 1), lambda p, k: (p, 0, 0, 0)),
        scratch_shapes=[pltpu.VMEM((5, b_fold, 1), jnp.float32)],
        compiler_params=pltpu.CompilerParams(
            dimension_semantics=("parallel", "arbitrary"),
            vmem_limit_bytes=32 * 1024 * 1024),
    )(src, est)

    # ---- tiny epilogue in plain JAX: combine per-core / per-sub-row moments
    # and recover mean-subtraction / projection / noise algebraically.
    m = jnp.sum(moments[..., 0], axis=0)          # (5, b_fold)
    if c > 1:
        m = jnp.sum(m.reshape(5, b, c), axis=-1)  # (5, b)
    sum_s, sum_e, sum_ss, sum_ee, sum_se = m

    inv_t = jnp.float32(1.0 / t)
    dot = sum_se - sum_s * sum_e * inv_t          # <s_c, e_c>
    ss = sum_ss - sum_s * sum_s * inv_t           # ||s_c||^2
    ee = sum_ee - sum_e * sum_e * inv_t           # ||e_c||^2
    ref_energy = ss + EPS
    alpha = dot / ref_energy                      # projection coefficient
    proj_energy = alpha * alpha * ss              # ||proj||^2
    # Clamp: f32 cancellation can make this slightly negative at high SNR.
    noise_energy = jnp.maximum(ee - 2.0 * alpha * dot + alpha * alpha * ss, 0.0)
    ratio = proj_energy / (noise_energy + EPS)
    sisnr = 10.0 * jnp.log10(ratio + EPS)         # (b,)
    return -jnp.mean(sisnr)


class SI_SNR:
    """Mirror of the PyTorch nn.Module interface."""

    def __init__(self):
        self.EPS = EPS

    def __call__(self, source, estimate_source):
        return si_snr_loss(source, estimate_source)


# --------------------------- pure-jnp reference -------------------------------
def _ref_si_snr(source, estimate_source):
    t = min(source.shape[-1], estimate_source.shape[-1])
    s = source[..., :t]
    e = estimate_source[..., :t]
    s = s - jnp.mean(s, axis=-1, keepdims=True)
    e = e - jnp.mean(e, axis=-1, keepdims=True)
    ref_energy = jnp.sum(s * s, axis=-1, keepdims=True) + EPS
    proj = jnp.sum(s * e, axis=-1, keepdims=True) * s / ref_energy
    noise = e - proj
    ratio = jnp.sum(proj ** 2, axis=-1) / (jnp.sum(noise ** 2, axis=-1) + EPS)
    sisnr = 10.0 * jnp.log10(ratio + EPS)
    return -jnp.mean(sisnr)


if __name__ == "__main__":
    key = jax.random.PRNGKey(0)
    k1, k2, k3, k4 = jax.random.split(key, 4)

    loss_fn = SI_SNR()

    # Case 1: truncation (source longer) + sublane fold (B=4 -> c=2, 8 rows) +
    # masked ragged tail, auto tile size (single grid step).
    B, T_SRC, T_EST = 4, 512, 500
    source = jax.random.normal(k1, (B, T_SRC), dtype=jnp.float32)
    estimate = source[..., :T_EST] + 0.1 * jax.random.normal(
        k2, (B, T_EST), dtype=jnp.float32)
    loss = jax.block_until_ready(loss_fn(source, estimate))
    ref = _ref_si_snr(source, estimate)
    assert jnp.allclose(loss, ref, rtol=1e-4, atol=1e-4), (loss, ref)

    # Case 2: same inputs, small explicit tile -> even tile count -> 2-way
    # "parallel" split with the masked last global tile on core 1.
    loss2 = jax.block_until_ready(si_snr_loss(source, estimate, tile_t=128))
    assert jnp.allclose(loss2, ref, rtol=1e-4, atol=1e-4), (loss2, ref)

    # Case 3: multi-tile steady state, no ragged tail (rem == 0), fold c=4,
    # 2-way parallel split with 2 tiles per core.
    B3, T3 = 2, 4096
    src3 = jax.random.normal(k3, (B3, T3), dtype=jnp.float32)
    est3 = 0.7 * src3 + 0.3 * jax.random.normal(k4, (B3, T3), dtype=jnp.float32)
    loss3 = jax.block_until_ready(si_snr_loss(src3, est3, tile_t=256))
    ref3 = _ref_si_snr(src3, est3)
    assert jnp.allclose(loss3, ref3, rtol=1e-4, atol=1e-4), (loss3, ref3)

    print("KERNEL_OK")
</pallas_src>

<mosaic_0001>
module attributes {stable_mosaic.version = 11 : i64} {
  func.func @_si_snr_moments_kernel(%arg0: i32, %arg1: i32, %arg2: memref<8x256xf32, #tpu.memory_space<vmem>>, %arg3: memref<8x256xf32, #tpu.memory_space<vmem>>, %arg4: memref<1x5x8x1xf32, #tpu.memory_space<vmem>>, %arg5: memref<5x8x1xf32, #tpu.memory_space<vmem>>) attributes {dimension_semantics = [#tpu.dimension_semantics<parallel>, #tpu.dimension_semantics<arbitrary>], iteration_bounds = array<i64: 1, 1>, scalar_prefetch = 0 : i64, scratch_operands = 1 : i64, tpu.core_type = #tpu.core_type<tc>, window_params = [{transform_indices = @transform_0, window_bounds = array<i64: 8, 256>}, {transform_indices = @transform_1, window_bounds = array<i64: 8, 256>}, {transform_indices = @transform_2, window_bounds = array<i64: 1, 5, 8, 1>}]} {
    %c0_i32 = arith.constant 0 : i32
    %0 = arith.cmpi eq, %arg1, %c0_i32 : i32
    %1 = arith.extui %0 : i1 to i32
    %c0_i32_0 = arith.constant 0 : i32
    %2 = arith.cmpi ne, %1, %c0_i32_0 : i32
    scf.if %2 {
      %cst = arith.constant 0.000000e+00 : f32
      %16 = vector.broadcast %cst : f32 to vector<5x8x1xf32>
      %c0_10 = arith.constant 0 : index
      %c0_11 = arith.constant 0 : index
      %c0_12 = arith.constant 0 : index
      %17 = vector.load %arg5[%c0_10, %c0_11, %c0_12] : memref<5x8x1xf32, #tpu.memory_space<vmem>>, vector<5x8x1xf32>
      tpu.vector_store %arg5[%c0_10, %c0_11, %c0_12], %16 {strides = array<i32>} : memref<5x8x1xf32, #tpu.memory_space<vmem>>, vector<5x8x1xf32>,
    } else {
    }
    %c0 = arith.constant 0 : index
    %c0_1 = arith.constant 0 : index
    %3 = vector.load %arg2[%c0, %c0_1] : memref<8x256xf32, #tpu.memory_space<vmem>>, vector<8x256xf32>
    %c0_2 = arith.constant 0 : index
    %c0_3 = arith.constant 0 : index
    %4 = vector.load %arg3[%c0_2, %c0_3] : memref<8x256xf32, #tpu.memory_space<vmem>>, vector<8x256xf32>
    %c0_i32_4 = arith.constant 0 : i32
    %5 = arith.cmpi eq, %arg0, %c0_i32_4 : i32
    %c0_i32_5 = arith.constant 0 : i32
    %6 = arith.cmpi eq, %arg1, %c0_i32_5 : i32
    %7 = arith.andi %5, %6 : i1
    %true = arith.constant true
    %8 = arith.xori %7, %true : i1
    %9 = arith.extui %8 : i1 to i32
    %c0_i32_6 = arith.constant 0 : i32
    %10 = arith.cmpi ne, %9, %c0_i32_6 : i32
    scf.if %10 {
      %c0_10 = arith.constant 0 : index
      %c0_11 = arith.constant 0 : index
      %c0_12 = arith.constant 0 : index
      %16 = vector.load %arg5[%c0_10, %c0_11, %c0_12] : memref<5x8x1xf32, #tpu.memory_space<vmem>>, vector<1x8x1xf32>
      %17 = vector.shape_cast %16 : vector<1x8x1xf32> to vector<8x1xf32>
      %cst = arith.constant dense<0.000000e+00> : vector<8xf32>
      %18 = vector.multi_reduction <add>, %3, %cst [1] : vector<8x256xf32> to vector<8xf32>
      %19 = vector.shape_cast %18 : vector<8xf32> to vector<8x1xf32>
      %20 = arith.addf %17, %19 : vector<8x1xf32>
      %c0_13 = arith.constant 0 : index
      %c0_14 = arith.constant 0 : index
      %c0_15 = arith.constant 0 : index
      %21 = vector.load %arg5[%c0_13, %c0_14, %c0_15] : memref<5x8x1xf32, #tpu.memory_space<vmem>>, vector<1x8x1xf32>
      %22 = vector.shape_cast %21 : vector<1x8x1xf32> to vector<8x1xf32>
      %23 = vector.shape_cast %20 : vector<8x1xf32> to vector<1x8x1xf32>
      tpu.vector_store %arg5[%c0_13, %c0_14, %c0_15], %23 {strides = array<i32>} : memref<5x8x1xf32, #tpu.memory_space<vmem>>, vector<1x8x1xf32>,
      %c1 = arith.constant 1 : index
      %c0_16 = arith.constant 0 : index
      %c0_17 = arith.constant 0 : index
      %24 = vector.load %arg5[%c1, %c0_16, %c0_17] : memref<5x8x1xf32, #tpu.memory_space<vmem>>, vector<1x8x1xf32>
      %25 = vector.shape_cast %24 : vector<1x8x1xf32> to vector<8x1xf32>
      %cst_18 = arith.constant dense<0.000000e+00> : vector<8xf32>
      %26 = vector.multi_reduction <add>, %4, %cst_18 [1] : vector<8x256xf32> to vector<8xf32>
      %27 = vector.shape_cast %26 : vector<8xf32> to vector<8x1xf32>
      %28 = arith.addf %25, %27 : vector<8x1xf32>
      %c1_19 = arith.constant 1 : index
      %c0_20 = arith.constant 0 : index
      %c0_21 = arith.constant 0 : index
      %29 = vector.load %arg5[%c1_19, %c0_20, %c0_21] : memref<5x8x1xf32, #tpu.memory_space<vmem>>, vector<1x8x1xf32>
      %30 = vector.shape_cast %29 : vector<1x8x1xf32> to vector<8x1xf32>
      %31 = vector.shape_cast %28 : vector<8x1xf32> to vector<1x8x1xf32>
      tpu.vector_store %arg5[%c1_19, %c0_20, %c0_21], %31 {strides = array<i32>} : memref<5x8x1xf32, #tpu.memory_space<vmem>>, vector<1x8x1xf32>,
      %c2 = arith.constant 2 : index
      %c0_22 = arith.constant 0 : index
      %c0_23 = arith.constant 0 : index
      %32 = vector.load %arg5[%c2, %c0_22, %c0_23] : memref<5x8x1xf32, #tpu.memory_space<vmem>>, vector<1x8x1xf32>
      %33 = vector.shape_cast %32 : vector<1x8x1xf32> to vector<8x1xf32>
      %34 = arith.mulf %3, %3 : vector<8x256xf32>
      %cst_24 = arith.constant dense<0.000000e+00> : vector<8xf32>
      %35 = vector.multi_reduction <add>, %34, %cst_24 [1] : vector<8x256xf32> to vector<8xf32>
      %36 = vector.shape_cast %35 : vector<8xf32> to vector<8x1xf32>
      %37 = arith.addf %33, %36 : vector<8x1xf32>
      %c2_25 = arith.constant 2 : index
      %c0_26 = arith.constant 0 : index
      %c0_27 = arith.constant 0 : index
      %38 = vector.load %arg5[%c2_25, %c0_26, %c0_27] : memref<5x8x1xf32, #tpu.memory_space<vmem>>, vector<1x8x1xf32>
      %39 = vector.shape_cast %38 : vector<1x8x1xf32> to vector<8x1xf32>
      %40 = vector.shape_cast %37 : vector<8x1xf32> to vector<1x8x1xf32>
      tpu.vector_store %arg5[%c2_25, %c0_26, %c0_27], %40 {strides = array<i32>} : memref<5x8x1xf32, #tpu.memory_space<vmem>>, vector<1x8x1xf32>,
      %c3 = arith.constant 3 : index
      %c0_28 = arith.constant 0 : index
      %c0_29 = arith.constant 0 : index
      %41 = vector.load %arg5[%c3, %c0_28, %c0_29] : memref<5x8x1xf32, #tpu.memory_space<vmem>>, vector<1x8x1xf32>
      %42 = vector.shape_cast %41 : vector<1x8x1xf32> to vector<8x1xf32>
      %43 = arith.mulf %4, %4 : vector<8x256xf32>
      %cst_30 = arith.constant dense<0.000000e+00> : vector<8xf32>
      %44 = vector.multi_reduction <add>, %43, %cst_30 [1] : vector<8x256xf32> to vector<8xf32>
      %45 = vector.shape_cast %44 : vector<8xf32> to vector<8x1xf32>
      %46 = arith.addf %42, %45 : vector<8x1xf32>
      %c3_31 = arith.constant 3 : index
      %c0_32 = arith.constant 0 : index
      %c0_33 = arith.constant 0 : index
      %47 = vector.load %arg5[%c3_31, %c0_32, %c0_33] : memref<5x8x1xf32, #tpu.memory_space<vmem>>, vector<1x8x1xf32>
      %48 = vector.shape_cast %47 : vector<1x8x1xf32> to vector<8x1xf32>
      %49 = vector.shape_cast %46 : vector<8x1xf32> to vector<1x8x1xf32>
      tpu.vector_store %arg5[%c3_31, %c0_32, %c0_33], %49 {strides = array<i32>} : memref<5x8x1xf32, #tpu.memory_space<vmem>>, vector<1x8x1xf32>,
      %c4 = arith.constant 4 : index
      %c0_34 = arith.constant 0 : index
      %c0_35 = arith.constant 0 : index
      %50 = vector.load %arg5[%c4, %c0_34, %c0_35] : memref<5x8x1xf32, #tpu.memory_space<vmem>>, vector<1x8x1xf32>
      %51 = vector.shape_cast %50 : vector<1x8x1xf32> to vector<8x1xf32>
      %52 = arith.mulf %3, %4 : vector<8x256xf32>
      %cst_36 = arith.constant dense<0.000000e+00> : vector<8xf32>
      %53 = vector.multi_reduction <add>, %52, %cst_36 [1] : vector<8x256xf32> to vector<8xf32>
      %54 = vector.shape_cast %53 : vector<8xf32> to vector<8x1xf32>
      %55 = arith.addf %51, %54 : vector<8x1xf32>
      %c4_37 = arith.constant 4 : index
      %c0_38 = arith.constant 0 : index
      %c0_39 = arith.constant 0 : index
      %56 = vector.load %arg5[%c4_37, %c0_38, %c0_39] : memref<5x8x1xf32, #tpu.memory_space<vmem>>, vector<1x8x1xf32>
      %57 = vector.shape_cast %56 : vector<1x8x1xf32> to vector<8x1xf32>
      %58 = vector.shape_cast %55 : vector<8x1xf32> to vector<1x8x1xf32>
      tpu.vector_store %arg5[%c4_37, %c0_38, %c0_39], %58 {strides = array<i32>} : memref<5x8x1xf32, #tpu.memory_space<vmem>>, vector<1x8x1xf32>,
    } else {
    }
    %11 = arith.extui %7 : i1 to i32
    %c0_i32_7 = arith.constant 0 : i32
    %12 = arith.cmpi ne, %11, %c0_i32_7 : i32
    scf.if %12 {
      %16 = tpu.iota {dimensions = array<i32: 1>} : vector<8x256xi32>
      %c250_i32 = arith.constant 250 : i32
      %17 = vector.broadcast %c250_i32 : i32 to vector<8x256xi32>
      %18 = arith.cmpi slt, %16, %17 : vector<8x256xi32>
      %cst = arith.constant 0.000000e+00 : f32
      %19 = vector.broadcast %cst : f32 to vector<8x256xf32>
      %20 = arith.select %18, %3, %19 : vector<8x256xi1>, vector<8x256xf32>
      %cst_10 = arith.constant 0.000000e+00 : f32
      %21 = vector.broadcast %cst_10 : f32 to vector<8x256xf32>
      %22 = arith.select %18, %4, %21 : vector<8x256xi1>, vector<8x256xf32>
      %c0_11 = arith.constant 0 : index
      %c0_12 = arith.constant 0 : index
      %c0_13 = arith.constant 0 : index
      %23 = vector.load %arg5[%c0_11, %c0_12, %c0_13] : memref<5x8x1xf32, #tpu.memory_space<vmem>>, vector<1x8x1xf32>
      %24 = vector.shape_cast %23 : vector<1x8x1xf32> to vector<8x1xf32>
      %cst_14 = arith.constant dense<0.000000e+00> : vector<8xf32>
      %25 = vector.multi_reduction <add>, %20, %cst_14 [1] : vector<8x256xf32> to vector<8xf32>
      %26 = vector.shape_cast %25 : vector<8xf32> to vector<8x1xf32>
      %27 = arith.addf %24, %26 : vector<8x1xf32>
      %c0_15 = arith.constant 0 : index
      %c0_16 = arith.constant 0 : index
      %c0_17 = arith.constant 0 : index
      %28 = vector.load %arg5[%c0_15, %c0_16, %c0_17] : memref<5x8x1xf32, #tpu.memory_space<vmem>>, vector<1x8x1xf32>
      %29 = vector.shape_cast %28 : vector<1x8x1xf32> to vector<8x1xf32>
      %30 = vector.shape_cast %27 : vector<8x1xf32> to vector<1x8x1xf32>
      tpu.vector_store %arg5[%c0_15, %c0_16, %c0_17], %30 {strides = array<i32>} : memref<5x8x1xf32, #tpu.memory_space<vmem>>, vector<1x8x1xf32>,
      %c1 = arith.constant 1 : index
      %c0_18 = arith.constant 0 : index
      %c0_19 = arith.constant 0 : index
      %31 = vector.load %arg5[%c1, %c0_18, %c0_19] : memref<5x8x1xf32, #tpu.memory_space<vmem>>, vector<1x8x1xf32>
      %32 = vector.shape_cast %31 : vector<1x8x1xf32> to vector<8x1xf32>
      %cst_20 = arith.constant dense<0.000000e+00> : vector<8xf32>
      %33 = vector.multi_reduction <add>, %22, %cst_20 [1] : vector<8x256xf32> to vector<8xf32>
      %34 = vector.shape_cast %33 : vector<8xf32> to vector<8x1xf32>
      %35 = arith.addf %32, %34 : vector<8x1xf32>
      %c1_21 = arith.constant 1 : index
      %c0_22 = arith.constant 0 : index
      %c0_23 = arith.constant 0 : index
      %36 = vector.load %arg5[%c1_21, %c0_22, %c0_23] : memref<5x8x1xf32, #tpu.memory_space<vmem>>, vector<1x8x1xf32>
      %37 = vector.shape_cast %36 : vector<1x8x1xf32> to vector<8x1xf32>
      %38 = vector.shape_cast %35 : vector<8x1xf32> to vector<1x8x1xf32>
      tpu.vector_store %arg5[%c1_21, %c0_22, %c0_23], %38 {strides = array<i32>} : memref<5x8x1xf32, #tpu.memory_space<vmem>>, vector<1x8x1xf32>,
      %c2 = arith.constant 2 : index
      %c0_24 = arith.constant 0 : index
      %c0_25 = arith.constant 0 : index
      %39 = vector.load %arg5[%c2, %c0_24, %c0_25] : memref<5x8x1xf32, #tpu.memory_space<vmem>>, vector<1x8x1xf32>
      %40 = vector.shape_cast %39 : vector<1x8x1xf32> to vector<8x1xf32>
      %41 = arith.mulf %20, %20 : vector<8x256xf32>
      %cst_26 = arith.constant dense<0.000000e+00> : vector<8xf32>
      %42 = vector.multi_reduction <add>, %41, %cst_26 [1] : vector<8x256xf32> to vector<8xf32>
      %43 = vector.shape_cast %42 : vector<8xf32> to vector<8x1xf32>
      %44 = arith.addf %40, %43 : vector<8x1xf32>
      %c2_27 = arith.constant 2 : index
      %c0_28 = arith.constant 0 : index
      %c0_29 = arith.constant 0 : index
      %45 = vector.load %arg5[%c2_27, %c0_28, %c0_29] : memref<5x8x1xf32, #tpu.memory_space<vmem>>, vector<1x8x1xf32>
      %46 = vector.shape_cast %45 : vector<1x8x1xf32> to vector<8x1xf32>
      %47 = vector.shape_cast %44 : vector<8x1xf32> to vector<1x8x1xf32>
      tpu.vector_store %arg5[%c2_27, %c0_28, %c0_29], %47 {strides = array<i32>} : memref<5x8x1xf32, #tpu.memory_space<vmem>>, vector<1x8x1xf32>,
      %c3 = arith.constant 3 : index
      %c0_30 = arith.constant 0 : index
      %c0_31 = arith.constant 0 : index
      %48 = vector.load %arg5[%c3, %c0_30, %c0_31] : memref<5x8x1xf32, #tpu.memory_space<vmem>>, vector<1x8x1xf32>
      %49 = vector.shape_cast %48 : vector<1x8x1xf32> to vector<8x1xf32>
      %50 = arith.mulf %22, %22 : vector<8x256xf32>
      %cst_32 = arith.constant dense<0.000000e+00> : vector<8xf32>
      %51 = vector.multi_reduction <add>, %50, %cst_32 [1] : vector<8x256xf32> to vector<8xf32>
      %52 = vector.shape_cast %51 : vector<8xf32> to vector<8x1xf32>
      %53 = arith.addf %49, %52 : vector<8x1xf32>
      %c3_33 = arith.constant 3 : index
      %c0_34 = arith.constant 0 : index
      %c0_35 = arith.constant 0 : index
      %54 = vector.load %arg5[%c3_33, %c0_34, %c0_35] : memref<5x8x1xf32, #tpu.memory_space<vmem>>, vector<1x8x1xf32>
      %55 = vector.shape_cast %54 : vector<1x8x1xf32> to vector<8x1xf32>
      %56 = vector.shape_cast %53 : vector<8x1xf32> to vector<1x8x1xf32>
      tpu.vector_store %arg5[%c3_33, %c0_34, %c0_35], %56 {strides = array<i32>} : memref<5x8x1xf32, #tpu.memory_space<vmem>>, vector<1x8x1xf32>,
      %c4 = arith.constant 4 : index
      %c0_36 = arith.constant 0 : index
      %c0_37 = arith.constant 0 : index
      %57 = vector.load %arg5[%c4, %c0_36, %c0_37] : memref<5x8x1xf32, #tpu.memory_space<vmem>>, vector<1x8x1xf32>
      %58 = vector.shape_cast %57 : vector<1x8x1xf32> to vector<8x1xf32>
      %59 = arith.mulf %20, %22 : vector<8x256xf32>
      %cst_38 = arith.constant dense<0.000000e+00> : vector<8xf32>
      %60 = vector.multi_reduction <add>, %59, %cst_38 [1] : vector<8x256xf32> to vector<8xf32>
      %61 = vector.shape_cast %60 : vector<8xf32> to vector<8x1xf32>
      %62 = arith.addf %58, %61 : vector<8x1xf32>
      %c4_39 = arith.constant 4 : index
      %c0_40 = arith.constant 0 : index
      %c0_41 = arith.constant 0 : index
      %63 = vector.load %arg5[%c4_39, %c0_40, %c0_41] : memref<5x8x1xf32, #tpu.memory_space<vmem>>, vector<1x8x1xf32>
      %64 = vector.shape_cast %63 : vector<1x8x1xf32> to vector<8x1xf32>
      %65 = vector.shape_cast %62 : vector<8x1xf32> to vector<1x8x1xf32>
      tpu.vector_store %arg5[%c4_39, %c0_40, %c0_41], %65 {strides = array<i32>} : memref<5x8x1xf32, #tpu.memory_space<vmem>>, vector<1x8x1xf32>,
    } else {
    }
    %c0_i32_8 = arith.constant 0 : i32
    %13 = arith.cmpi eq, %arg1, %c0_i32_8 : i32
    %14 = arith.extui %13 : i1 to i32
    %c0_i32_9 = arith.constant 0 : i32
    %15 = arith.cmpi ne, %14, %c0_i32_9 : i32
    scf.if %15 {
      %c0_10 = arith.constant 0 : index
      %c0_11 = arith.constant 0 : index
      %c0_12 = arith.constant 0 : index
      %16 = vector.load %arg5[%c0_10, %c0_11, %c0_12] : memref<5x8x1xf32, #tpu.memory_space<vmem>>, vector<5x8x1xf32>
      %c0_13 = arith.constant 0 : index
      %c0_14 = arith.constant 0 : index
      %c0_15 = arith.constant 0 : index
      %c0_16 = arith.constant 0 : index
      %17 = vector.load %arg4[%c0_13, %c0_14, %c0_15, %c0_16] : memref<1x5x8x1xf32, #tpu.memory_space<vmem>>, vector<1x5x8x1xf32>
      %18 = vector.shape_cast %17 : vector<1x5x8x1xf32> to vector<5x8x1xf32>
      %19 = vector.shape_cast %16 : vector<5x8x1xf32> to vector<1x5x8x1xf32>
      tpu.vector_store %arg4[%c0_13, %c0_14, %c0_15, %c0_16], %19 {strides = array<i32>} : memref<1x5x8x1xf32, #tpu.memory_space<vmem>>, vector<1x5x8x1xf32>,
    } else {
    }
    return
  }
  func.func @transform_0(%arg0: i32, %arg1: i32) -> (i32, i32) {
    %c1_i32 = arith.constant 1 : i32
    %0 = arith.muli %arg0, %c1_i32 : i32
    %1 = arith.addi %0, %arg1 : i32
    %c0_i32 = arith.constant 0 : i32
    %c0_i32_0 = arith.constant 0 : i32
    return %c0_i32, %1 : i32, i32
  }
  func.func @transform_1(%arg0: i32, %arg1: i32) -> (i32, i32) {
    %c1_i32 = arith.constant 1 : i32
    %0 = arith.muli %arg0, %c1_i32 : i32
    %1 = arith.addi %0, %arg1 : i32
    %c0_i32 = arith.constant 0 : i32
    %c0_i32_0 = arith.constant 0 : i32
    return %c0_i32, %1 : i32, i32
  }
  func.func @transform_2(%arg0: i32, %arg1: i32) -> (i32, i32, i32, i32) {
    %c0_i32 = arith.constant 0 : i32
    %c0_i32_0 = arith.constant 0 : i32
    %c0_i32_1 = arith.constant 0 : i32
    %c0_i32_2 = arith.constant 0 : i32
    return %arg0, %c0_i32, %c0_i32_0, %c0_i32_1 : i32, i32, i32, i32
  }
}

</mosaic_0001>

<bundles_post_ra>
// kernel: tpu_custom_call.1
= control target key start
LH: loop header
LB: loop body
LE: loop exit
PB: predicated region body
PF: predicated region fallthrough
CT: control target
= control target key end

     0   :  { %7 = vsyncpa [#allocation4], 0  ;;  %s303_s0 = inlined_call_operand.hbm [shape: f32[8,250], index: 0, kind: input, shape index: {}]   ;;  %s304_s1 = inlined_call_operand.hbm [shape: f32[8,250], index: 1, kind: input, shape index: {}]   ;;  %s305_s2 = inlined_call_operand.vmem [shape: f32[1,5,8,1], index: 2, kind: output, shape index: {}]  }
   0x1   :  { %8 = vsyncpa [#allocation6], 0  ;;  %s231_s9 = smov [#allocation3]   ;;  %s232_s11 = smov [#allocation5]  }
   0x2   :  { %s19_s10 = sshll.u32 %s231_s9, 4  ;;  %s33_s12 = sshll.u32 %s232_s11, 4  ;;  %s20_s10 = int_to_ptr.vmem [resolvable:$true] %s19_s10  ;;  %s34_s12 = int_to_ptr.vmem [resolvable:$true] %s33_s12 }
   0x3   :  { %s183_s15 = scalar_lea.hbm %s303_s0, 256 }
   0x4   :  { %p184_p0 = scmp.ne.s32.totalorder %s303_s0, %s183_s15  ;;  %p187_p1 = scmp.lt.u32.totalorder %s183_s15, %s303_s0 }
   0x6   :  { %p189_p2 = pnand %p187_p1, %p184_p0 }
   0x8   :  { %192 = shalt.err (!%p189_p2)
}
   0x9   :  { %s193_s20 = scalar_lea.vmem %s20_s10, 256  ;;  %p198_p4 = scmp.lt.s32.totalorder %s20_s10, %s20_s10 }
   0xa   :  { %p194_p3 = scmp.ne.s32.totalorder %s20_s10, %s193_s20  ;;  %p199_p5 = scmp.lt.s32.totalorder %s193_s20, %s193_s20 }
   0xc   :  { %p200_p6 = por %p199_p5, %p198_p4 }
   0xe   :  { %p201_p7 = pnand %p200_p6, %p194_p3 }
  0x10   :  { %204 = shalt.err (!%p201_p7)
}
  0x11   :  { %22 = dma.hbm_to_vmem [thread:$0]  %s303_s0, 256, %s20_s10, [#allocation4]  }
  0x12   :  { %s205_s25 = scalar_lea.hbm %s304_s1, 256 }
  0x13   :  { %p206_p8 = scmp.ne.s32.totalorder %s304_s1, %s205_s25  ;;  %p209_p9 = scmp.lt.u32.totalorder %s205_s25, %s304_s1 }
  0x15   :  { %p211_p10 = pnand %p209_p9, %p206_p8 }
  0x17   :  { %214 = shalt.err (!%p211_p10)
}
  0x18   :  { %s215_s30 = scalar_lea.vmem %s34_s12, 256  ;;  %p220_p12 = scmp.lt.s32.totalorder %s34_s12, %s34_s12 }
  0x19   :  { %p216_p11 = scmp.ne.s32.totalorder %s34_s12, %s215_s30  ;;  %p221_p13 = scmp.lt.s32.totalorder %s215_s30, %s215_s30 }
  0x1b   :  { %p222_p0 = por %p221_p13, %p220_p12 }
  0x1d   :  { %p223_p1 = pnand %p222_p0, %p216_p11 }
  0x1f   :  { %226 = shalt.err (!%p223_p1)
}
  0x20   :  { %36 = dma.hbm_to_vmem [thread:$0]  %s304_s1, 256, %s34_s12, [#allocation6]  }
  0x21   :  { %227 = dma.done.wait [#allocation4], 256  }
  0x22   :  { %228 = vsyncadd [#allocation4], 4294967040 }
  0x23   :  { %229 = dma.done.wait [#allocation6], 256  }
  0x24   :  { %230 = vsyncadd [#allocation6], 4294967040  ;;  %v66_v0 = vlaneseq  ;;  %vm51_vm0 = vcmask 7168   ;;  %v233_v1 = vmov 0.0   ;;  %v57_v4 = vld [vmem:[#allocation3] sm:$0xff]  ;;  %v58_v5 = vld [vmem:[#allocation3 + $0x8] sm:$0xff] }
  0x25   :  { %52 = vst.msk [vmem:[#allocation2] sm:$0xff] %vm51_vm0, %v233_v1  ;;  %53 = vst.msk [vmem:[#allocation2 + $0x8] sm:$0xff] %vm51_vm0, %v233_v1  ;;  %v91_v7 = vmul.f32 %v57_v4, %v57_v4  ;;  %v59_v8 = vld [vmem:[#allocation5] sm:$0xff]  ;;  %v60_v9 = vld [vmem:[#allocation5 + $0x8] sm:$0xff] }
  0x26   :  { %54 = vst.msk [vmem:[#allocation2 + $0x10] sm:$0xff] %vm51_vm0, %v233_v1  ;;  %55 = vst.msk [vmem:[#allocation2 + $0x18] sm:$0xff] %vm51_vm0, %v233_v1  ;;  %v67_v2 = vand.u32 127, %v66_v0  ;;  %v100_v13 = vmul.f32 %v59_v8, %v59_v8  ;;  %v109_v17 = vmul.f32 %v59_v8, %v57_v4 }
  0x27   :  { %56 = vst.msk [vmem:[#allocation2 + $0x20] sm:$0xff] %vm51_vm0, %v233_v1 }
  0x28   :  { %v68_v3 = vadd.s32 128, %v67_v2 }
  0x2a   :  { %vm70_vm1 = vcmp.lt.s32.totalorder %v68_v3, 250 }
  0x2b   :  { %v72_v6 = vsel %vm70_vm1, %v58_v5, 0.0  ;;  %v74_v12 = vsel %vm70_vm1, %v60_v9, 0.0 }
  0x2c   :  { %v76_v10 = vadd.f32 %v72_v6, %v57_v4  ;;  %v92_v11 = vmul.f32 %v72_v6, %v72_v6  ;;  %v101_v14 = vmul.f32 %v74_v12, %v74_v12  ;;  %v84_v16 = vadd.f32 %v74_v12, %v59_v8  ;;  %v75_v21 = vld [vmem:[#allocation2] sm:$0xff]  ;;  %v83_v26 = vld [vmem:[#allocation2 + $0x8] sm:$0xff] }
  0x2d   :  { %v110_v18 = vmul.f32 %v74_v12, %v72_v6  ;;  %v90_v23 = vld [vmem:[#allocation2 + $0x10] sm:$0xff]  ;;  %v99_v29 = vld [vmem:[#allocation2 + $0x18] sm:$0xff] }
  0x2e   :  { %77 = vadd.xlane.f32.xlu0 %v76_v10  ;;  %v93_v15 = vadd.f32 %v92_v11, %v91_v7  ;;  %v102_v19 = vadd.f32 %v101_v14, %v100_v13  ;;  %v108_v32 = vld [vmem:[#allocation2 + $0x20] sm:$0xff] }
  0x2f   :  { %v111_v20 = vadd.f32 %v110_v18, %v109_v17 }
  0x30   :  { %94 = vadd.xlane.f32.xlu1 %v93_v15 }
  0x32   :  { %85 = vadd.xlane.f32.xlu0 %v84_v16 }
  0x34   :  { %103 = vadd.xlane.f32.xlu1 %v102_v19 }
  0x36   :  { %112 = vadd.xlane.f32.xlu0 %v111_v20 }
  0xbb   :  { %v78_v22 = vpop.xlane.xlu0 %77 }
  0xbc   :  { %v79_v24 = vadd.f32 %v78_v22, %v75_v21 }
  0xbd   :  { %v95_v25 = vpop.xlane.xlu1 %94 }
  0xbe   :  { %81 = vst.msk [vmem:[#allocation2] sm:$0xff] %vm51_vm0, %v79_v24  ;;  %v96_v27 = vadd.f32 %v95_v25, %v90_v23 }
  0xbf   :  { %v86_v28 = vpop.xlane.xlu0 %85 }
  0xc0   :  { %97 = vst.msk [vmem:[#allocation2 + $0x10] sm:$0xff] %vm51_vm0, %v96_v27  ;;  %v87_v30 = vadd.f32 %v86_v28, %v83_v26 }
  0xc1   :  { %v104_v31 = vpop.xlane.xlu1 %103 }
  0xc2   :  { %88 = vst.msk [vmem:[#allocation2 + $0x8] sm:$0xff] %vm51_vm0, %v87_v30  ;;  %v105_v33 = vadd.f32 %v104_v31, %v99_v29 }
  0xc3   :  { %v113_v34 = vpop.xlane.xlu0 %112 }
  0xc4   :  { %106 = vst.msk [vmem:[#allocation2 + $0x18] sm:$0xff] %vm51_vm0, %v105_v33  ;;  %v114_v35 = vadd.f32 %v113_v34, %v108_v32 }
  0xc5   :  { %v163_v36 = vld [vmem:[#allocation2] sm:$0xff] }
  0xc6   :  { %169 = vst.msk [vmem:[%s305_s2] sm:$0xff] %vm51_vm0, %v163_v36  ;;  %115 = vst.msk [vmem:[#allocation2 + $0x20] sm:$0xff] %vm51_vm0, %v114_v35 }
  0xc7   :  { %v165_v37 = vld [vmem:[#allocation2 + $0x10] sm:$0xff] }
  0xc8   :  { %171 = vst.msk [vmem:[%s305_s2 + $0x10] sm:$0xff] %vm51_vm0, %v165_v37 }
  0xc9   :  { %v164_v38 = vld [vmem:[#allocation2 + $0x8] sm:$0xff] }
  0xca   :  { %170 = vst.msk [vmem:[%s305_s2 + $0x8] sm:$0xff] %vm51_vm0, %v164_v38 }
  0xcb   :  { %v166_v39 = vld [vmem:[#allocation2 + $0x18] sm:$0xff] }
  0xcc   :  { %172 = vst.msk [vmem:[%s305_s2 + $0x18] sm:$0xff] %vm51_vm0, %v166_v39 }
  0xcd   :  { %v167_v40 = vld [vmem:[#allocation2 + $0x20] sm:$0xff] }
  0xce   :  { %173 = vst.msk [vmem:[%s305_s2 + $0x20] sm:$0xff] %vm51_vm0, %v167_v40 }
  0xcf   :  { %178 = vsyncpa [#allocation4], 1 }
  0xd0   :  { %179 = vsyncpa [#allocation6], 1 }

</bundles_post_ra>
